<compile_context>
chip_gen: v7x
topology: tpu7x:2x2x1
jax: 0.10.0
libtpu: 0.0.40
codegen_flags: <defaults>
</compile_context>

<pallas_src>
import functools

import jax
import jax.numpy as jnp
from jax.experimental import pallas as pl
from jax.experimental.pallas import tpu as pltpu


def _round_up(x, m):
    return ((x + m - 1) // m) * m


def _tpu_generation():
    """Best-effort TPU generation from device_kind (0 if unknown)."""
    try:
        kind = jax.devices()[0].device_kind.lower()
    except Exception:
        return 0
    if "v7" in kind or "7x" in kind:
        return 7
    if "v6" in kind:
        return 6
    if "v5" in kind:
        return 5
    if "v4" in kind:
        return 4
    return 0


def _physical_vmem_bytes():
    """Best-effort physical VMEM capacity query (None if unavailable)."""
    try:
        info = pltpu.get_tpu_info()
        return getattr(info, "vmem_capacity_bytes", None)
    except Exception:
        return None


def _residual_linear_kernel(x_ref, w_ref, b_ref, o_ref, *, tn, d_pad):
    """One (tm, tn) output tile:  o = x @ W + b + x   (full K in one block).

    x_ref : (tm, d_pad)   full-K row slab; also supplies the residual tile
    w_ref : (d_pad, tn)   full-K column slab of W
    b_ref : (1, tn)       bias slice
    o_ref : (tm, tn)
    """
    acc = jnp.dot(x_ref[...], w_ref[...], preferred_element_type=jnp.float32)

    # Residual term: slice the already-resident LHS slab instead of a 2nd DMA.
    if tn == d_pad:
        x_res = x_ref[...]
    else:
        j0 = pl.multiple_of(pl.program_id(1) * tn, 128)
        x_res = x_ref[:, pl.ds(j0, tn)]

    out = acc + b_ref[...].astype(jnp.float32) + x_res.astype(jnp.float32)
    o_ref[...] = out.astype(o_ref.dtype)


def residual_linear(x, w, b, *, tm_max=256, vmem_budget_bytes=None):
    """Residual(Linear)(x) = x @ w + b + x.

    x: [B, S, D]   w: [D, D]   b: [D]
    """
    B, S, D = x.shape
    M = B * S
    orig_dtype = x.dtype

    gen = _tpu_generation()
    num_tc = 2 if gen >= 7 else 1

    # ---- per-generation VMEM budget / scoped-limit cap
    if vmem_budget_bytes is None:
        if gen >= 7:
            vmem_budget_bytes = 32 << 20   # 64 MiB physical per TC: stay well under
        elif gen == 6:
            vmem_budget_bytes = 56 << 20   # 128 MiB physical
        elif gen == 5:
            vmem_budget_bytes = 48 << 20   # 128 MiB physical, 16 MiB scoped default
        else:
            vmem_budget_bytes = 32 << 20
    vmem_cap = (60 << 20) if gen >= 7 else (100 << 20)
    phys = _physical_vmem_bytes()
    if phys is not None:
        vmem_cap = min(vmem_cap, int(phys * 0.9))
        vmem_budget_bytes = min(vmem_budget_bytes, int(phys * 0.6))

    # ---- lane multiple: v6e / v7x MXU is 2x 256x256 -> prefer 256-multiples
    #      when it adds no extra K padding; v5e (4x 128x128) is fine at 128.
    d_pad128 = _round_up(D, 128)
    lane_mult = 256 if (gen >= 6 and d_pad128 % 256 == 0) else 128
    D_pad = _round_up(D, lane_mult)

    x2d = x.reshape(M, D)
    M8 = _round_up(M, 8)

    # ---- row tile: multiple of 8 that divides round_up(M, 8) (no M pad needed
    #      when M % 8 == 0, avoiding a full padded HBM copy of x).
    def _pick_tm(limit):
        limit = max(8, min(int(limit), M8))
        limit -= limit % 8
        limit = max(limit, 8)
        for cand in range(limit, 7, -8):
            if M8 % cand == 0:
                return cand
        return 8

    tm = _pick_tm(tm_max)
    # Megacore: only on multi-TC parts (v7x) make sure the row axis has >= 2
    # tiles so both TensorCores get work.
    if num_tc > 1 and (M8 // tm) < num_tc and tm > 8:
        tm = _pick_tm(tm // 2)

    # ---- column tile: divisor of D_pad, multiple of 128 (prefer full D_pad).
    def _pick_tn(limit):
        limit = max(128, min(int(limit), D_pad))
        limit -= limit % 128
        limit = max(limit, 128)
        for cand in range(limit, 127, -128):
            if D_pad % cand == 0:
                return cand
        return 128

    # ---- accurate VMEM accounting (real itemsizes, real buffer counts,
    #      f32 accumulator / epilogue headroom).
    x_item = jnp.dtype(x.dtype).itemsize
    w_item = jnp.dtype(w.dtype).itemsize
    b_item = jnp.dtype(b.dtype).itemsize
    o_item = jnp.dtype(orig_dtype).itemsize

    def vmem_need(tm_, tn_):
        grid_i = M8 // tm_
        grid_j = D_pad // tn_
        x_bufs = 2 if grid_i > 1 else 1          # x block index changes with i
        wb_bufs = 1 if grid_j == 1 else 2        # single-buffered when j-extent 1
        o_bufs = 2 if (grid_i > 1 or grid_j > 1) else 1
        return (x_bufs * tm_ * D_pad * x_item
                + wb_bufs * D_pad * tn_ * w_item
                + wb_bufs * tn_ * b_item
                + o_bufs * tm_ * tn_ * o_item
                + 2 * tm_ * tn_ * 4)             # f32 acc + epilogue temporaries

    # ---- budget: shrink tm FIRST (keeps tn == D_pad -> W single-pass,
    #      lane-dense output stores); only then shrink tn.
    tn = D_pad
    while vmem_need(tm, tn) > vmem_budget_bytes and tm > 8:
        tm = _pick_tm(tm // 2)
    while vmem_need(tm, tn) > vmem_budget_bytes and tn > 128:
        tn = _pick_tn(tn // 2)
    # TODO(synk): for huge D where even the (8, D_pad) x slab + (D_pad, 128) W
    # slab overflow VMEM, fall back to a K-looped accumulator kernel.

    # ---- pad operands only where required (zeros are exact for matmul+residual)
    M_pad = M8
    if M_pad != M or D_pad != D:
        x2d = jnp.pad(x2d, ((0, M_pad - M), (0, D_pad - D)))
    w_p = jnp.pad(w, ((0, D_pad - D), (0, D_pad - D))) if D_pad != D else w
    b_p = jnp.pad(b, (0, D_pad - D)) if D_pad != D else b
    b2d = b_p.reshape(1, D_pad)

    grid = (M_pad // tm, D_pad // tn)
    grid_i, grid_j = grid

    kernel = functools.partial(_residual_linear_kernel, tn=tn, d_pad=D_pad)

    need = vmem_need(tm, tn)
    vmem_limit = int(min(vmem_cap, max(need + (8 << 20), 32 << 20)))
    compiler_params = pltpu.CompilerParams(
        # Row axis carries megacore sharding (matters on v7x); the j axis, when
        # it exists, runs sequentially so both cores never duplicate the x slab.
        dimension_semantics=("parallel", "arbitrary"),
        vmem_limit_bytes=vmem_limit,
    )

    w_reads = 1 if grid_j == 1 else grid_i
    cost = pl.CostEstimate(
        flops=int(2 * M_pad * D_pad * D_pad + 2 * M_pad * D_pad),
        transcendentals=0,
        bytes_accessed=int(M_pad * D_pad * x_item
                           + w_reads * D_pad * D_pad * w_item
                           + D_pad * b_item
                           + M_pad * D_pad * o_item),
    )

    def _build_and_call(single_buffer_wb):
        # W / bias block indices never change when grid_j == 1 -> single buffer
        # reclaims a full W-sized VMEM buffer.
        wb_kwargs = {"pipeline_mode": pl.Buffered(1)} if single_buffer_wb else {}
        grid_spec = pltpu.PrefetchScalarGridSpec(
            num_scalar_prefetch=0,
            grid=grid,
            in_specs=[
                # x: full-K row slab, fetched once per row tile; doubles as the
                # residual source.
                pl.BlockSpec((tm, D_pad), lambda i, j: (i, 0)),
                pl.BlockSpec((D_pad, tn), lambda i, j: (0, j), **wb_kwargs),
                pl.BlockSpec((1, tn), lambda i, j: (0, j), **wb_kwargs),
            ],
            out_specs=pl.BlockSpec((tm, tn), lambda i, j: (i, j)),
        )
        out = pl.pallas_call(
            kernel,
            out_shape=jax.ShapeDtypeStruct((M_pad, D_pad), orig_dtype),
            grid_spec=grid_spec,
            compiler_params=compiler_params,
            cost_estimate=cost,
        )(x2d, w_p, b2d)
        return jax.block_until_ready(out)

    try:
        out2d = _build_and_call(single_buffer_wb=(grid_j == 1))
    except Exception:
        # Fall back to default double-buffering if Buffered(1) is unsupported.
        out2d = _build_and_call(single_buffer_wb=False)

    out2d = out2d[:M, :D]
    return out2d.reshape(B, S, D)


if __name__ == "__main__":
    # Small deterministic problem: batch=2, seq=64, hidden=256
    B, S, D = 2, 64, 256
    key = jax.random.PRNGKey(0)
    kx, kw, kb = jax.random.split(key, 3)

    x = jax.random.normal(kx, (B, S, D), dtype=jnp.float32)
    # fn = Linear(D, D): deterministic synthetic weights (no checkpoint load)
    w = jax.random.normal(kw, (D, D), dtype=jnp.float32) * (1.0 / jnp.sqrt(D))
    b = jax.random.normal(kb, (D,), dtype=jnp.float32) * 0.01

    out = residual_linear(x, w, b)
    jax.block_until_ready(out)

    # Reference check: Residual semantics = fn(x) + x
    ref = (
        jnp.einsum("bsd,de->bse", x, w, precision=jax.lax.Precision.HIGHEST)
        + b
        + x
    )
    assert out.shape == x.shape and out.dtype == x.dtype
    assert jnp.allclose(out, ref, atol=2e-3, rtol=2e-3), "mismatch vs reference"

    print("KERNEL_OK")
</pallas_src>

<mosaic_0001>
module attributes {stable_mosaic.version = 11 : i64} {
  func.func @_residual_linear_kernel(%arg0: i32, %arg1: i32, %arg2: memref<128x256xf32, #tpu.memory_space<vmem>>, %arg3: memref<256x256xf32, #tpu.memory_space<vmem>>, %arg4: memref<1x256xf32, #tpu.memory_space<vmem>>, %arg5: memref<128x256xf32, #tpu.memory_space<vmem>>) attributes {dimension_semantics = [#tpu.dimension_semantics<parallel>, #tpu.dimension_semantics<arbitrary>], iteration_bounds = array<i64: 1, 1>, scalar_prefetch = 0 : i64, scratch_operands = 0 : i64, tpu.core_type = #tpu.core_type<tc>, window_params = [{transform_indices = @transform_0, window_bounds = array<i64: 128, 256>}, {pipeline_mode = #tpu.pipeline_mode<synchronous>, transform_indices = @transform_1, window_bounds = array<i64: 256, 256>}, {pipeline_mode = #tpu.pipeline_mode<synchronous>, transform_indices = @transform_2, window_bounds = array<i64: 1, 256>}, {transform_indices = @transform_3, window_bounds = array<i64: 128, 256>}]} {
    %c0 = arith.constant 0 : index
    %c0_0 = arith.constant 0 : index
    %0 = vector.load %arg2[%c0, %c0_0] : memref<128x256xf32, #tpu.memory_space<vmem>>, vector<128x256xf32>
    %c0_1 = arith.constant 0 : index
    %c0_2 = arith.constant 0 : index
    %1 = vector.load %arg3[%c0_1, %c0_2] : memref<256x256xf32, #tpu.memory_space<vmem>>, vector<256x256xf32>
    %cst = arith.constant dense<0.000000e+00> : vector<128x256xf32>
    %2 = tpu.matmul %0, %1, %cst {dimension_numbers = #tpu.dot_dimension_numbers<[1], [0], [0], [1], [0, 0, 1, 1], [], []>} : vector<128x256xf32>, vector<256x256xf32>, vector<128x256xf32> -> vector<128x256xf32>
    %c0_3 = arith.constant 0 : index
    %c0_4 = arith.constant 0 : index
    %3 = vector.load %arg2[%c0_3, %c0_4] : memref<128x256xf32, #tpu.memory_space<vmem>>, vector<128x256xf32>
    %c0_5 = arith.constant 0 : index
    %c0_6 = arith.constant 0 : index
    %4 = vector.load %arg4[%c0_5, %c0_6] : memref<1x256xf32, #tpu.memory_space<vmem>>, vector<1x256xf32>
    %5 = vector.broadcast %4 : vector<1x256xf32> to vector<128x256xf32>
    %6 = arith.addf %2, %5 : vector<128x256xf32>
    %7 = arith.addf %6, %3 : vector<128x256xf32>
    %c0_7 = arith.constant 0 : index
    %c0_8 = arith.constant 0 : index
    %8 = vector.load %arg5[%c0_7, %c0_8] : memref<128x256xf32, #tpu.memory_space<vmem>>, vector<128x256xf32>
    tpu.vector_store %arg5[%c0_7, %c0_8], %7 {strides = array<i32>} : memref<128x256xf32, #tpu.memory_space<vmem>>, vector<128x256xf32>,
    return
  }
  func.func @transform_0(%arg0: i32, %arg1: i32) -> (i32, i32) {
    %c0_i32 = arith.constant 0 : i32
    %c0_i32_0 = arith.constant 0 : i32
    return %arg0, %c0_i32 : i32, i32
  }
  func.func @transform_1(%arg0: i32, %arg1: i32) -> (i32, i32) {
    %c0_i32 = arith.constant 0 : i32
    %c0_i32_0 = arith.constant 0 : i32
    return %c0_i32, %arg1 : i32, i32
  }
  func.func @transform_2(%arg0: i32, %arg1: i32) -> (i32, i32) {
    %c0_i32 = arith.constant 0 : i32
    %c0_i32_0 = arith.constant 0 : i32
    return %c0_i32, %arg1 : i32, i32
  }
  func.func @transform_3(%arg0: i32, %arg1: i32) -> (i32, i32) {
    %c0_i32 = arith.constant 0 : i32
    return %arg0, %arg1 : i32, i32
  }
}

module attributes {stable_mosaic.version = 11 : i64} {
  func.func @_residual_linear_kernel(%arg0: i32, %arg1: i32, %arg2: memref<128x256xf32, #tpu.memory_space<vmem>>, %arg3: memref<256x256xf32, #tpu.memory_space<vmem>>, %arg4: memref<1x256xf32, #tpu.memory_space<vmem>>, %arg5: memref<128x256xf32, #tpu.memory_space<vmem>>) attributes {dimension_semantics = [#tpu.dimension_semantics<parallel>, #tpu.dimension_semantics<arbitrary>], iteration_bounds = array<i64: 1, 1>, scalar_prefetch = 0 : i64, scratch_operands = 0 : i64, tpu.core_type = #tpu.core_type<tc>, window_params = [{transform_indices = @transform_0, window_bounds = array<i64: 128, 256>}, {transform_indices = @transform_1, window_bounds = array<i64: 256, 256>}, {transform_indices = @transform_2, window_bounds = array<i64: 1, 256>}, {transform_indices = @transform_3, window_bounds = array<i64: 128, 256>}]} {
    %c0 = arith.constant 0 : index
    %c0_0 = arith.constant 0 : index
    %0 = vector.load %arg2[%c0, %c0_0] : memref<128x256xf32, #tpu.memory_space<vmem>>, vector<128x256xf32>
    %c0_1 = arith.constant 0 : index
    %c0_2 = arith.constant 0 : index
    %1 = vector.load %arg3[%c0_1, %c0_2] : memref<256x256xf32, #tpu.memory_space<vmem>>, vector<256x256xf32>
    %cst = arith.constant dense<0.000000e+00> : vector<128x256xf32>
    %2 = tpu.matmul %0, %1, %cst {dimension_numbers = #tpu.dot_dimension_numbers<[1], [0], [0], [1], [0, 0, 1, 1], [], []>} : vector<128x256xf32>, vector<256x256xf32>, vector<128x256xf32> -> vector<128x256xf32>
    %c0_3 = arith.constant 0 : index
    %c0_4 = arith.constant 0 : index
    %3 = vector.load %arg2[%c0_3, %c0_4] : memref<128x256xf32, #tpu.memory_space<vmem>>, vector<128x256xf32>
    %c0_5 = arith.constant 0 : index
    %c0_6 = arith.constant 0 : index
    %4 = vector.load %arg4[%c0_5, %c0_6] : memref<1x256xf32, #tpu.memory_space<vmem>>, vector<1x256xf32>
    %5 = vector.broadcast %4 : vector<1x256xf32> to vector<128x256xf32>
    %6 = arith.addf %2, %5 : vector<128x256xf32>
    %7 = arith.addf %6, %3 : vector<128x256xf32>
    %c0_7 = arith.constant 0 : index
    %c0_8 = arith.constant 0 : index
    %8 = vector.load %arg5[%c0_7, %c0_8] : memref<128x256xf32, #tpu.memory_space<vmem>>, vector<128x256xf32>
    tpu.vector_store %arg5[%c0_7, %c0_8], %7 {strides = array<i32>} : memref<128x256xf32, #tpu.memory_space<vmem>>, vector<128x256xf32>,
    return
  }
  func.func @transform_0(%arg0: i32, %arg1: i32) -> (i32, i32) {
    %c0_i32 = arith.constant 0 : i32
    %c0_i32_0 = arith.constant 0 : i32
    return %arg0, %c0_i32 : i32, i32
  }
  func.func @transform_1(%arg0: i32, %arg1: i32) -> (i32, i32) {
    %c0_i32 = arith.constant 0 : i32
    %c0_i32_0 = arith.constant 0 : i32
    return %c0_i32, %arg1 : i32, i32
  }
  func.func @transform_2(%arg0: i32, %arg1: i32) -> (i32, i32) {
    %c0_i32 = arith.constant 0 : i32
    %c0_i32_0 = arith.constant 0 : i32
    return %c0_i32, %arg1 : i32, i32
  }
  func.func @transform_3(%arg0: i32, %arg1: i32) -> (i32, i32) {
    %c0_i32 = arith.constant 0 : i32
    return %arg0, %arg1 : i32, i32
  }
}

</mosaic_0001>

<bundles_post_ra>
// kernel: tpu_custom_call.1
= control target key start
LH: loop header
LB: loop body
LE: loop exit
PB: predicated region body
PF: predicated region fallthrough
CT: control target
= control target key end

     0   :  { %8 = vsyncpa [#allocation3], 0  ;;  %s804_s0 = inlined_call_operand.hbm [shape: f32[128,256], index: 0, kind: input, shape index: {}]   ;;  %s805_s1 = inlined_call_operand.hbm [shape: f32[256,256], index: 1, kind: input, shape index: {}]   ;;  %s806_s2 = inlined_call_operand.vmem [shape: f32[1,256], index: 2, kind: input, shape index: {}]   ;;  %s807_s3 = inlined_call_operand.hbm [shape: f32[128,256], index: 3, kind: output, shape index: {}]  }
   0x1   :  { %9 = vsyncpa [#allocation6], 0 }
   0x2   :  { %10 = vsyncpa [#allocation4], 0  ;;  %s567_s12 = smov [#allocation2]   ;;  %s495_s16 = scalar_lea.hbm %s804_s0, 4096 }
   0x3   :  { %s16_s13 = sshll.u32 %s567_s12, 4  ;;  %p496_p0 = scmp.ne.s32.totalorder %s804_s0, %s495_s16  ;;  %s17_s13 = int_to_ptr.vmem [resolvable:$true] %s16_s13 }
   0x4   :  { %p499_p1 = scmp.lt.u32.totalorder %s495_s16, %s804_s0 }
   0x6   :  { %p501_p2 = pnand %p499_p1, %p496_p0 }
   0x8   :  { %504 = shalt.err (!%p501_p2)
}
   0x9   :  { %s505_s21 = scalar_lea.vmem %s17_s13, 4096  ;;  %p510_p4 = scmp.lt.s32.totalorder %s17_s13, %s17_s13 }
   0xa   :  { %p506_p3 = scmp.ne.s32.totalorder %s17_s13, %s505_s21  ;;  %p511_p5 = scmp.lt.s32.totalorder %s505_s21, %s505_s21 }
   0xc   :  { %p512_p6 = por %p511_p5, %p510_p4 }
   0xe   :  { %p513_p7 = pnand %p512_p6, %p506_p3 }
  0x10   :  { %516 = shalt.err (!%p513_p7)
}
  0x11   :  { %s568_s22 = smov 256   ;;  %s569_s23 = smov 16  }
  0x12   :  { %22 = dma.hbm_to_vmem [thread:$0]  %s804_s0, 4096, %s17_s13, [#allocation3], %s568_s22, %s568_s22, %s569_s23  }
  0x13   :  { %s570_s26 = smov [#allocation5]   ;;  %s517_s30 = scalar_lea.hbm %s805_s1, 8192 }
  0x14   :  { %s28_s27 = sshll.u32 %s570_s26, 4  ;;  %p518_p8 = scmp.ne.s32.totalorder %s805_s1, %s517_s30  ;;  %s29_s27 = int_to_ptr.vmem [resolvable:$true] %s28_s27 }
  0x15   :  { %p521_p9 = scmp.lt.u32.totalorder %s517_s30, %s805_s1 }
  0x17   :  { %p523_p10 = pnand %p521_p9, %p518_p8 }
  0x19   :  { %526 = shalt.err (!%p523_p10)
}
  0x1a   :  { %s527_s8 = scalar_lea.vmem %s29_s27, 8192  ;;  %p532_p12 = scmp.lt.s32.totalorder %s29_s27, %s29_s27 }
  0x1b   :  { %p528_p11 = scmp.ne.s32.totalorder %s29_s27, %s527_s8  ;;  %p533_p13 = scmp.lt.s32.totalorder %s527_s8, %s527_s8 }
  0x1d   :  { %p534_p0 = por %p533_p13, %p532_p12 }
  0x1f   :  { %p535_p1 = pnand %p534_p0, %p528_p11 }
  0x21   :  { %538 = shalt.err (!%p535_p1)
}
  0x22   :  { %34 = dma.hbm_to_vmem [thread:$0]  %s805_s1, 8192, %s29_s27, [#allocation6], %s568_s22, %s568_s22, %s569_s23  }
  0x23   :  { %561 = dma.done.wait [#allocation3], 4096  }
  0x24   :  { %562 = vsyncadd [#allocation3], 4294963200 }
  0x25   :  { %563 = dma.done.wait [#allocation6], 8192  }
  0x26   :  { %564 = vsyncadd [#allocation6], 4294959104  ;;  %v76_v0 = vld [vmem:[#allocation5 + $0x8] sm:$0xff]  ;;  %v78_v1 = vld [vmem:[#allocation5 + $0x18] sm:$0xff] }
  0x27   :  { %v75_v2 = vld [vmem:[#allocation5] sm:$0xff]  ;;  %v394_v3 = vpack.c.bf16 %v78_v1, %v76_v0  ;;  %v77_v4 = vld [vmem:[#allocation5 + $0x10] sm:$0xff]  ;;  %v80_v5 = vld [vmem:[#allocation5 + $0x28] sm:$0xff] }
  0x28   :  { %v82_v6 = vld [vmem:[#allocation5 + $0x38] sm:$0xff]  ;;  %v396_v7 = vpack.c.bf16 %v77_v4, %v75_v2  ;;  %v79_v9 = vld [vmem:[#allocation5 + $0x20] sm:$0xff]  ;;  %v81_v10 = vld [vmem:[#allocation5 + $0x30] sm:$0xff] }
  0x29   :  { %v398_v8 = vpack.c.bf16 %v82_v6, %v80_v5  ;;  %v84_v11 = vld [vmem:[#allocation5 + $0x48] sm:$0xff]  ;;  %395 = vmatprep.subr.bf16.mxu0 %v394_v3  ;;  %458 = vmatprep.subr.bf16.mxu1 %v394_v3  ;;  %v86_v12 = vld [vmem:[#allocation5 + $0x58] sm:$0xff]  ;;  %v400_v13 = vpack.c.bf16 %v81_v10, %v79_v9  ;;  %v83_v15 = vld [vmem:[#allocation5 + $0x40] sm:$0xff] }
  0x2a   :  { %397 = vmatpush1.bf16.msra.mxu0 %v396_v7  ;;  %474 = vmatpush1.bf16.msra.mxu1 %v396_v7  ;;  %v402_v14 = vpack.c.bf16 %v86_v12, %v84_v11  ;;  %v85_v16 = vld [vmem:[#allocation5 + $0x50] sm:$0xff]  ;;  %v88_v17 = vld [vmem:[#allocation5 + $0x68] sm:$0xff]  ;;  %v90_v18 = vld [vmem:[#allocation5 + $0x78] sm:$0xff] }
  0x2b   :  { %399 = vmatprep.subr.bf16.mxu0 %v398_v8  ;;  %459 = vmatprep.subr.bf16.mxu1 %v398_v8  ;;  %v404_v19 = vpack.c.bf16 %v85_v16, %v83_v15  ;;  %v406_v20 = vpack.c.bf16 %v90_v18, %v88_v17  ;;  %v87_v21 = vld [vmem:[#allocation5 + $0x60] sm:$0xff]  ;;  %v89_v22 = vld [vmem:[#allocation5 + $0x70] sm:$0xff]  ;;  %v92_v23 = vld [vmem:[#allocation5 + $0x88] sm:$0xff] }
  0x2c   :  { %v94_v24 = vld [vmem:[#allocation5 + $0x98] sm:$0xff]  ;;  %v408_v25 = vpack.c.bf16 %v89_v22, %v87_v21  ;;  %v91_v27 = vld [vmem:[#allocation5 + $0x80] sm:$0xff]  ;;  %v93_v28 = vld [vmem:[#allocation5 + $0x90] sm:$0xff] }
  0x2d   :  { %v410_v26 = vpack.c.bf16 %v94_v24, %v92_v23  ;;  %v96_v29 = vld [vmem:[#allocation5 + $0xa8] sm:$0xff]  ;;  %v98_v30 = vld [vmem:[#allocation5 + $0xb8] sm:$0xff]  ;;  %v412_v31 = vpack.c.bf16 %v93_v28, %v91_v27  ;;  %v95_v33 = vld [vmem:[#allocation5 + $0xa0] sm:$0xff] }
  0x2e   :  { %401 = vmatpush1.bf16.msra.mxu0 %v400_v13  ;;  %475 = vmatpush1.bf16.msra.mxu1 %v400_v13  ;;  %v414_v32 = vpack.c.bf16 %v98_v30, %v96_v29  ;;  %v97_v34 = vld [vmem:[#allocation5 + $0xb0] sm:$0xff]  ;;  %v100_v35 = vld [vmem:[#allocation5 + $0xc8] sm:$0xff]  ;;  %v102_v36 = vld [vmem:[#allocation5 + $0xd8] sm:$0xff] }
  0x2f   :  { %403 = vmatprep.subr.bf16.mxu0 %v402_v14  ;;  %460 = vmatprep.subr.bf16.mxu1 %v402_v14  ;;  %v416_v37 = vpack.c.bf16 %v97_v34, %v95_v33  ;;  %v99_v38 = vld [vmem:[#allocation5 + $0xc0] sm:$0xff]  ;;  %v418_v39 = vpack.c.bf16 %v102_v36, %v100_v35  ;;  %v101_v40 = vld [vmem:[#allocation5 + $0xd0] sm:$0xff]  ;;  %v622_v41 = vld [vmem:[#allocation2 + $0x8] sm:$0xff] }
  0x30   :  { %v624_v42 = vld [vmem:[#allocation2 + $0x88] sm:$0xff]  ;;  %v106_v44 = vld [vmem:[#allocation5 + $0xf8] sm:$0xff]  ;;  %215 = vmatprep.mubr.f32.mxu0 %v622_v41  ;;  %v420_v45 = vpack.c.bf16 %v101_v40, %v99_v38  ;;  %v103_v47 = vld [vmem:[#allocation5 + $0xe0] sm:$0xff] }
  0x31   :  { %v104_v43 = vld [vmem:[#allocation5 + $0xe8] sm:$0xff]  ;;  %263 = vmatprep.mubr.f32.mxu1 %v624_v42  ;;  %v105_v48 = vld [vmem:[#allocation5 + $0xf0] sm:$0xff]  ;;  %v110_v50 = vld [vmem:[#allocation5 + $0x118] sm:$0xff] }
  0x32   :  { %405 = vmatpush1.bf16.msra.mxu0 %v404_v19  ;;  %476 = vmatpush1.bf16.msra.mxu1 %v404_v19  ;;  %v422_v46 = vpack.c.bf16 %v106_v44, %v104_v43  ;;  %v108_v49 = vld [vmem:[#allocation5 + $0x108] sm:$0xff]  ;;  %v424_v51 = vpack.c.bf16 %v105_v48, %v103_v47  ;;  %v107_v53 = vld [vmem:[#allocation5 + $0x100] sm:$0xff]  ;;  %v109_v54 = vld [vmem:[#allocation5 + $0x110] sm:$0xff] }
  0x33   :  { %407 = vmatprep.subr.bf16.mxu0 %v406_v20  ;;  %461 = vmatprep.subr.bf16.mxu1 %v406_v20  ;;  %v426_v52 = vpack.c.bf16 %v110_v50, %v108_v49  ;;  %v112_v55 = vld [vmem:[#allocation5 + $0x128] sm:$0xff]  ;;  %v114_v56 = vld [vmem:[#allocation5 + $0x138] sm:$0xff]  ;;  %v428_v57 = vpack.c.bf16 %v109_v54, %v107_v53  ;;  %v111_v59 = vld [vmem:[#allocation5 + $0x120] sm:$0xff] }
  0x34   :  { %v430_v58 = vpack.c.bf16 %v114_v56, %v112_v55  ;;  %v113_v60 = vld [vmem:[#allocation5 + $0x130] sm:$0xff]  ;;  %v116_v61 = vld [vmem:[#allocation5 + $0x148] sm:$0xff]  ;;  %v118_v62 = vld [vmem:[#allocation5 + $0x158] sm:$0xff] }
  0x35   :  { %v432_v63 = vpack.c.bf16 %v113_v60, %v111_v59  ;;  %v434_v0 = vpack.c.bf16 %v118_v62, %v116_v61  ;;  %v115_v1 = vld [vmem:[#allocation5 + $0x140] sm:$0xff]  ;;  %v117_v2 = vld [vmem:[#allocation5 + $0x150] sm:$0xff]  ;;  %v120_v3 = vld [vmem:[#allocation5 + $0x168] sm:$0xff] }
  0x36   :  { %409 = vmatpush1.bf16.msra.mxu0 %v408_v25  ;;  %477 = vmatpush1.bf16.msra.mxu1 %v408_v25  ;;  %v122_v4 = vld [vmem:[#allocation5 + $0x178] sm:$0xff]  ;;  %v436_v5 = vpack.c.bf16 %v117_v2, %v115_v1  ;;  %v119_v7 = vld [vmem:[#allocation5 + $0x160] sm:$0xff]  ;;  %v121_v8 = vld [vmem:[#allocation5 + $0x170] sm:$0xff]  ;;  %v141_v2 = vlaneseq }
  0x37   :  { %411 = vmatprep.subr.bf16.mxu0 %v410_v26  ;;  %462 = vmatprep.subr.bf16.mxu1 %v410_v26  ;;  %v438_v6 = vpack.c.bf16 %v122_v4, %v120_v3  ;;  %v124_v9 = vld [vmem:[#allocation5 + $0x188] sm:$0xff]  ;;  %v126_v10 = vld [vmem:[#allocation5 + $0x198] sm:$0xff]  ;;  %v440_v11 = vpack.c.bf16 %v121_v8, %v119_v7  ;;  %v123_v13 = vld [vmem:[#allocation5 + $0x180] sm:$0xff] }
  0x38   :  { %v442_v12 = vpack.c.bf16 %v126_v10, %v124_v9  ;;  %v125_v14 = vld [vmem:[#allocation5 + $0x190] sm:$0xff]  ;;  %v128_v15 = vld [vmem:[#allocation5 + $0x1a8] sm:$0xff]  ;;  %v130_v16 = vld [vmem:[#allocation5 + $0x1b8] sm:$0xff]  ;;  %v142_v3 = vshrl.u32 %v141_v2, 7 }
  0x39   :  { %v444_v17 = vpack.c.bf16 %v125_v14, %v123_v13  ;;  %v446_v18 = vpack.c.bf16 %v130_v16, %v128_v15  ;;  %v127_v19 = vld [vmem:[#allocation5 + $0x1a0] sm:$0xff]  ;;  %v129_v20 = vld [vmem:[#allocation5 + $0x1b0] sm:$0xff]  ;;  %v132_v21 = vld [vmem:[#allocation5 + $0x1c8] sm:$0xff] }
  0x3a   :  { %413 = vmatpush1.bf16.msra.mxu0 %v412_v31  ;;  %478 = vmatpush1.bf16.msra.mxu1 %v412_v31  ;;  %v134_v22 = vld [vmem:[#allocation5 + $0x1d8] sm:$0xff]  ;;  %v448_v23 = vpack.c.bf16 %v129_v20, %v127_v19  ;;  %v131_v25 = vld [vmem:[#allocation5 + $0x1c0] sm:$0xff]  ;;  %v133_v26 = vld [vmem:[#allocation5 + $0x1d0] sm:$0xff]  ;;  %v143_v4 = vsub.s32 0, %v142_v3 }
  0x3b   :  { %415 = vmatprep.subr.bf16.mxu0 %v414_v32  ;;  %463 = vmatprep.subr.bf16.mxu1 %v414_v32  ;;  %v450_v24 = vpack.c.bf16 %v134_v22, %v132_v21  ;;  %v136_v27 = vld [vmem:[#allocation5 + $0x1e8] sm:$0xff]  ;;  %v138_v28 = vld [vmem:[#allocation5 + $0x1f8] sm:$0xff]  ;;  %v452_v29 = vpack.c.bf16 %v133_v26, %v131_v25  ;;  %v135_v31 = vld [vmem:[#allocation5 + $0x1e0] sm:$0xff] }
  0x3c   :  { %v454_v30 = vpack.c.bf16 %v138_v28, %v136_v27  ;;  %v137_v32 = vld [vmem:[#allocation5 + $0x1f0] sm:$0xff]  ;;  %v628_v34 = vld [vmem:[#allocation2] sm:$0xff]  ;;  %v632_v36 = vld [vmem:[#allocation2 + $0x18] sm:$0xff] }
  0x3d   :  { %v456_v33 = vpack.c.bf16 %v137_v32, %v135_v31  ;;  %v630_v35 = vld [vmem:[#allocation2 + $0x80] sm:$0xff]  ;;  %v640_v38 = vld [vmem:[#allocation2 + $0x10] sm:$0xff]  ;;  %v644_v40 = vld [vmem:[#allocation2 + $0x28] sm:$0xff] }
  0x3e   :  { %417 = vmatpush1.bf16.msra.mxu0 %v416_v37  ;;  %479 = vmatpush1.bf16.msra.mxu1 %v416_v37  ;;  %v634_v37 = vld [vmem:[#allocation2 + $0x98] sm:$0xff]  ;;  %v646_v43 = vld [vmem:[#allocation2 + $0xa8] sm:$0xff]  ;;  %v652_v44 = vld [vmem:[#allocation2 + $0x20] sm:$0xff] }
  0x3f   :  { %419 = vmatprep.subr.bf16.mxu0 %v418_v39  ;;  %464 = vmatprep.subr.bf16.mxu1 %v418_v39  ;;  %v642_v39 = vld [vmem:[#allocation2 + $0x90] sm:$0xff]  ;;  %v658_v47 = vld [vmem:[#allocation2 + $0xb8] sm:$0xff]  ;;  %v668_v50 = vld [vmem:[#allocation2 + $0x48] sm:$0xff] }
  0x40   :  { %v664_v48 = vld [vmem:[#allocation2 + $0x30] sm:$0xff]  ;;  %v678_v53 = vld [vmem:[#allocation2 + $0xc0] sm:$0xff]  ;;  %v680_v54 = vld [vmem:[#allocation2 + $0x58] sm:$0xff] }
  0x41   :  { %v666_v49 = vld [vmem:[#allocation2 + $0xb0] sm:$0xff]  ;;  %v682_v55 = vld [vmem:[#allocation2 + $0xd8] sm:$0xff]  ;;  %v694_v59 = vld [vmem:[#allocation2 + $0xe8] sm:$0xff] }
  0x42   :  { %421 = vmatpush1.bf16.msra.mxu0 %v420_v45  ;;  %480 = vmatpush1.bf16.msra.mxu1 %v420_v45  ;;  %v654_v45 = vld [vmem:[#allocation2 + $0xa0] sm:$0xff]  ;;  %v688_v56 = vld [vmem:[#allocation2 + $0x50] sm:$0xff]  ;;  %v704_v62 = vld [vmem:[#allocation2 + $0x78] sm:$0xff] }
  0x43   :  { %423 = vmatprep.subr.bf16.mxu0 %v422_v46  ;;  %465 = vmatprep.subr.bf16.mxu1 %v422_v46  ;;  %v656_v46 = vld [vmem:[#allocation2 + $0x38] sm:$0xff]  ;;  %v700_v60 = vld [vmem:[#allocation2 + $0x60] sm:$0xff]  ;;  %v714_v1 = vld [vmem:[#allocation2 + $0xf0] sm:$0xff] }
  0x44   :  { %v702_v61 = vld [vmem:[#allocation2 + $0xe0] sm:$0xff] }
  0x46   :  { %425 = vmatpush1.bf16.msra.mxu0 %v424_v51  ;;  %481 = vmatpush1.bf16.msra.mxu1 %v424_v51  ;;  %v670_v51 = vld [vmem:[#allocation2 + $0xc8] sm:$0xff] }
  0x47   :  { %427 = vmatprep.subr.bf16.mxu0 %v426_v52  ;;  %466 = vmatprep.subr.bf16.mxu1 %v426_v52  ;;  %v676_v52 = vld [vmem:[#allocation2 + $0x40] sm:$0xff] }
  0x4a   :  { %429 = vmatpush1.bf16.msra.mxu0 %v428_v57  ;;  %482 = vmatpush1.bf16.msra.mxu1 %v428_v57  ;;  %v690_v57 = vld [vmem:[#allocation2 + $0xd0] sm:$0xff] }
  0x4b   :  { %431 = vmatprep.subr.bf16.mxu0 %v430_v58  ;;  %467 = vmatprep.subr.bf16.mxu1 %v430_v58  ;;  %v692_v58 = vld [vmem:[#allocation2 + $0x68] sm:$0xff] }
  0x4e   :  { %433 = vmatpush1.bf16.msra.mxu0 %v432_v63  ;;  %483 = vmatpush1.bf16.msra.mxu1 %v432_v63  ;;  %v706_v63 = vld [vmem:[#allocation2 + $0xf8] sm:$0xff] }
  0x4f   :  { %435 = vmatprep.subr.bf16.mxu0 %v434_v0  ;;  %468 = vmatprep.subr.bf16.mxu1 %v434_v0  ;;  %v712_v0 = vld [vmem:[#allocation2 + $0x70] sm:$0xff] }
  0x52   :  { %437 = vmatpush1.bf16.msra.mxu0 %v436_v5  ;;  %484 = vmatpush1.bf16.msra.mxu1 %v436_v5  ;;  %v139_v5 = vld [vmem:[%s806_s2] sm:$0x3]  ;;  %s571_s2 = smov [#allocation7]  }
  0x53   :  { %439 = vmatprep.subr.bf16.mxu0 %v438_v6  ;;  %469 = vmatprep.subr.bf16.mxu1 %v438_v6  ;;  %v147_v6 = vsub.s32 1, %v142_v3  ;;  %v721_v7 = vrot.slane %v139_v5, %v143_v4  ;;  %s381_s11 = sshll.u32 %s571_s2, 4  ;;  %s382_s11 = int_to_ptr.vmem [resolvable:$true] %s381_s11 }
  0x54   :  { %s539_s12 = scalar_lea.vmem %s382_s11, 4096  ;;  %p544_p3 = scmp.lt.s32.totalorder %s382_s11, %s382_s11 }
  0x55   :  { %v723_v8 = vrot.slane %v139_v5, %v147_v6  ;;  %p540_p2 = scmp.ne.s32.totalorder %s382_s11, %s539_s12  ;;  %p545_p4 = scmp.lt.s32.totalorder %s539_s12, %s539_s12 }
  0x56   :  { %441 = vmatpush1.bf16.msra.mxu0 %v440_v11  ;;  %485 = vmatpush1.bf16.msra.mxu1 %v440_v11 }
  0x57   :  { %443 = vmatprep.subr.bf16.mxu0 %v442_v12  ;;  %470 = vmatprep.subr.bf16.mxu1 %v442_v12  ;;  %p546_p5 = por %p545_p4, %p544_p3 }
  0x59   :  { %p547_p6 = pnand %p546_p5, %p540_p2 }
  0x5a   :  { %445 = vmatpush1.bf16.msra.mxu0 %v444_v17  ;;  %486 = vmatpush1.bf16.msra.mxu1 %v444_v17 }
  0x5b   :  { %447 = vmatprep.subr.bf16.mxu0 %v446_v18  ;;  %471 = vmatprep.subr.bf16.mxu1 %v446_v18 }
  0x5e   :  { %449 = vmatpush1.bf16.msra.mxu0 %v448_v23  ;;  %487 = vmatpush1.bf16.msra.mxu1 %v448_v23 }
  0x5f   :  { %451 = vmatprep.subr.bf16.mxu0 %v450_v24  ;;  %472 = vmatprep.subr.bf16.mxu1 %v450_v24 }
  0x62   :  { %453 = vmatpush1.bf16.msra.mxu0 %v452_v29  ;;  %488 = vmatpush1.bf16.msra.mxu1 %v452_v29 }
  0x63   :  { %455 = vmatprep.subr.bf16.mxu0 %v454_v30  ;;  %473 = vmatprep.subr.bf16.mxu1 %v454_v30 }
  0x66   :  { %457 = vmatpush1.bf16.msra.mxu0 %v456_v33  ;;  %489 = vmatpush1.bf16.msra.mxu1 %v456_v33 }
  0x69   :  { %216 = vmatmul.mubr.f32.vlgmr.msra.gmra.mrb[0].mxu0 %v628_v34  ;;  %264 = vmatmul.mubr.f32.vlgmr.msra.gmra.mrb[0].mxu1 %v630_v35 }
  0x6a   :  { %221 = vmatprep.mubr.f32.mxu0 %v632_v36  ;;  %269 = vmatprep.mubr.f32.mxu1 %v634_v37 }
  0x6d   :  { %222 = vmatmul.mubr.f32.gmra.mrb[2].mxu0 %v640_v38  ;;  %270 = vmatmul.mubr.f32.gmra.mrb[2].mxu1 %v642_v39 }
  0x6e   :  { %227 = vmatprep.mubr.f32.mxu0 %v644_v40  ;;  %275 = vmatprep.mubr.f32.mxu1 %v646_v43 }
  0x71   :  { %228 = vmatmul.mubr.f32.gmra.mrb[4].mxu0 %v652_v44  ;;  %276 = vmatmul.mubr.f32.gmra.mrb[4].mxu1 %v654_v45 }
  0x72   :  { %233 = vmatprep.mubr.f32.mxu0 %v656_v46  ;;  %281 = vmatprep.mubr.f32.mxu1 %v658_v47 }
  0x75   :  { %234 = vmatmul.mubr.f32.gmra.mrb[6].mxu0 %v664_v48  ;;  %282 = vmatmul.mubr.f32.gmra.mrb[6].mxu1 %v666_v49 }
  0x76   :  { %239 = vmatprep.mubr.f32.mxu0 %v668_v50  ;;  %287 = vmatprep.mubr.f32.mxu1 %v670_v51 }
  0x79   :  { %240 = vmatmul.mubr.f32.gmra.mrb[8].mxu0 %v676_v52  ;;  %288 = vmatmul.mubr.f32.gmra.mrb[8].mxu1 %v678_v53 }
  0x7a   :  { %245 = vmatprep.mubr.f32.mxu0 %v680_v54  ;;  %293 = vmatprep.mubr.f32.mxu1 %v682_v55 }
  0x7d   :  { %246 = vmatmul.mubr.f32.gmra.mrb[10].mxu0 %v688_v56  ;;  %294 = vmatmul.mubr.f32.gmra.mrb[10].mxu1 %v690_v57 }
  0x7e   :  { %251 = vmatprep.mubr.f32.mxu0 %v692_v58  ;;  %299 = vmatprep.mubr.f32.mxu1 %v694_v59 }
  0x81   :  { %252 = vmatmul.mubr.f32.gmra.mrb[12].mxu0 %v700_v60  ;;  %300 = vmatmul.mubr.f32.gmra.mrb[12].mxu1 %v702_v61 }
  0x82   :  { %257 = vmatprep.mubr.f32.mxu0 %v704_v62  ;;  %305 = vmatprep.mubr.f32.mxu1 %v706_v63 }
  0x85   :  { %258 = vmatmul.mubr.f32.gmra.mrb[14].mxu0 %v712_v0  ;;  %306 = vmatmul.mubr.f32.gmra.mrb[14].mxu1 %v714_v1 }
 0x13c   :  { %v217_v9 = vpop.f32.mrb[0].mxu0  ;;  %v265_v10 = vpop.f32.mrb[0].mxu1 }
 0x13d   :  { %v218_v11 = vadd.f32 %v217_v9, %v721_v7  ;;  %v266_v12 = vadd.f32 %v265_v10, %v721_v7  ;;  %v219_v13 = vpop.f32.mrb[1].mxu0  ;;  %v267_v14 = vpop.f32.mrb[1].mxu1 }
 0x13e   :  { %v220_v15 = vadd.f32 %v219_v13, %v723_v8  ;;  %v268_v16 = vadd.f32 %v267_v14, %v723_v8 }
 0x13f   :  { %v312_v17 = vadd.f32 %v218_v11, %v628_v34  ;;  %v328_v18 = vadd.f32 %v266_v12, %v630_v35 }
 0x140   :  { %v313_v19 = vadd.f32 %v220_v15, %v622_v41  ;;  %v329_v20 = vadd.f32 %v268_v16, %v624_v42  ;;  %v223_v21 = vpop.f32.mrb[2].mxu0  ;;  %v271_v22 = vpop.f32.mrb[2].mxu1 }
 0x141   :  { %344 = vst [vmem:[#allocation7] sm:$0xff] %v312_v17  ;;  %360 = vst [vmem:[#allocation7 + $0x80] sm:$0xff] %v328_v18  ;;  %v224_v23 = vadd.f32 %v223_v21, %v721_v7  ;;  %v272_v24 = vadd.f32 %v271_v22, %v721_v7  ;;  %v225_v25 = vpop.f32.mrb[3].mxu0  ;;  %v273_v26 = vpop.f32.mrb[3].mxu1 }
 0x142   :  { %345 = vst [vmem:[#allocation7 + $0x8] sm:$0xff] %v313_v19  ;;  %361 = vst [vmem:[#allocation7 + $0x88] sm:$0xff] %v329_v20  ;;  %v226_v27 = vadd.f32 %v225_v25, %v723_v8  ;;  %v274_v28 = vadd.f32 %v273_v26, %v723_v8 }
 0x143   :  { %v314_v41 = vadd.f32 %v224_v23, %v640_v38  ;;  %v330_v42 = vadd.f32 %v272_v24, %v642_v39 }
 0x144   :  { %v315_v29 = vadd.f32 %v226_v27, %v632_v36  ;;  %v331_v30 = vadd.f32 %v274_v28, %v634_v37  ;;  %v229_v31 = vpop.f32.mrb[4].mxu0  ;;  %v277_v32 = vpop.f32.mrb[4].mxu1 }
 0x145   :  { %346 = vst [vmem:[#allocation7 + $0x10] sm:$0xff] %v314_v41  ;;  %362 = vst [vmem:[#allocation7 + $0x90] sm:$0xff] %v330_v42  ;;  %v230_v33 = vadd.f32 %v229_v31, %v721_v7  ;;  %v278_v34 = vadd.f32 %v277_v32, %v721_v7  ;;  %v231_v35 = vpop.f32.mrb[5].mxu0  ;;  %v279_v2 = vpop.f32.mrb[5].mxu1 }
 0x146   :  { %347 = vst [vmem:[#allocation7 + $0x18] sm:$0xff] %v315_v29  ;;  %363 = vst [vmem:[#allocation7 + $0x98] sm:$0xff] %v331_v30  ;;  %v232_v38 = vadd.f32 %v231_v35, %v723_v8  ;;  %v280_v39 = vadd.f32 %v279_v2, %v723_v8 }
 0x147   :  { %v316_v36 = vadd.f32 %v230_v33, %v652_v44  ;;  %v332_v37 = vadd.f32 %v278_v34, %v654_v45 }
 0x148   :  { %v317_v3 = vadd.f32 %v232_v38, %v644_v40  ;;  %v333_v4 = vadd.f32 %v280_v39, %v646_v43  ;;  %v235_v5 = vpop.f32.mrb[6].mxu0  ;;  %v283_v6 = vpop.f32.mrb[6].mxu1 }
 0x149   :  { %348 = vst [vmem:[#allocation7 + $0x20] sm:$0xff] %v316_v36  ;;  %364 = vst [vmem:[#allocation7 + $0xa0] sm:$0xff] %v332_v37  ;;  %v236_v9 = vadd.f32 %v235_v5, %v721_v7  ;;  %v284_v10 = vadd.f32 %v283_v6, %v721_v7  ;;  %v237_v11 = vpop.f32.mrb[7].mxu0  ;;  %v285_v12 = vpop.f32.mrb[7].mxu1 }
 0x14a   :  { %349 = vst [vmem:[#allocation7 + $0x28] sm:$0xff] %v317_v3  ;;  %365 = vst [vmem:[#allocation7 + $0xa8] sm:$0xff] %v333_v4  ;;  %v238_v44 = vadd.f32 %v237_v11, %v723_v8  ;;  %v286_v45 = vadd.f32 %v285_v12, %v723_v8 }
 0x14b   :  { %v318_v40 = vadd.f32 %v236_v9, %v664_v48  ;;  %v334_v43 = vadd.f32 %v284_v10, %v666_v49 }
 0x14c   :  { %v319_v13 = vadd.f32 %v238_v44, %v656_v46  ;;  %v335_v14 = vadd.f32 %v286_v45, %v658_v47  ;;  %v241_v15 = vpop.f32.mrb[8].mxu0  ;;  %v289_v16 = vpop.f32.mrb[8].mxu1 }
 0x14d   :  { %350 = vst [vmem:[#allocation7 + $0x30] sm:$0xff] %v318_v40  ;;  %366 = vst [vmem:[#allocation7 + $0xb0] sm:$0xff] %v334_v43  ;;  %v242_v17 = vadd.f32 %v241_v15, %v721_v7  ;;  %v290_v18 = vadd.f32 %v289_v16, %v721_v7  ;;  %v243_v19 = vpop.f32.mrb[9].mxu0  ;;  %v291_v20 = vpop.f32.mrb[9].mxu1 }
 0x14e   :  { %351 = vst [vmem:[#allocation7 + $0x38] sm:$0xff] %v319_v13  ;;  %367 = vst [vmem:[#allocation7 + $0xb8] sm:$0xff] %v335_v14  ;;  %v244_v48 = vadd.f32 %v243_v19, %v723_v8  ;;  %v292_v49 = vadd.f32 %v291_v20, %v723_v8 }
 0x14f   :  { %v320_v46 = vadd.f32 %v242_v17, %v676_v52  ;;  %v336_v47 = vadd.f32 %v290_v18, %v678_v53 }
 0x150   :  { %v321_v21 = vadd.f32 %v244_v48, %v668_v50  ;;  %v337_v22 = vadd.f32 %v292_v49, %v670_v51  ;;  %v247_v23 = vpop.f32.mrb[10].mxu0  ;;  %v295_v24 = vpop.f32.mrb[10].mxu1 }
 0x151   :  { %352 = vst [vmem:[#allocation7 + $0x40] sm:$0xff] %v320_v46  ;;  %368 = vst [vmem:[#allocation7 + $0xc0] sm:$0xff] %v336_v47  ;;  %v248_v25 = vadd.f32 %v247_v23, %v721_v7  ;;  %v296_v26 = vadd.f32 %v295_v24, %v721_v7  ;;  %v249_v27 = vpop.f32.mrb[11].mxu0  ;;  %v297_v28 = vpop.f32.mrb[11].mxu1 }
 0x152   :  { %353 = vst [vmem:[#allocation7 + $0x48] sm:$0xff] %v321_v21  ;;  %369 = vst [vmem:[#allocation7 + $0xc8] sm:$0xff] %v337_v22  ;;  %v250_v52 = vadd.f32 %v249_v27, %v723_v8  ;;  %v298_v53 = vadd.f32 %v297_v28, %v723_v8 }
 0x153   :  { %v322_v50 = vadd.f32 %v248_v25, %v688_v56  ;;  %v338_v51 = vadd.f32 %v296_v26, %v690_v57 }
 0x154   :  { %v323_v41 = vadd.f32 %v250_v52, %v680_v54  ;;  %v339_v42 = vadd.f32 %v298_v53, %v682_v55  ;;  %v253_v29 = vpop.f32.mrb[12].mxu0  ;;  %v301_v30 = vpop.f32.mrb[12].mxu1 }
 0x155   :  { %354 = vst [vmem:[#allocation7 + $0x50] sm:$0xff] %v322_v50  ;;  %370 = vst [vmem:[#allocation7 + $0xd0] sm:$0xff] %v338_v51  ;;  %v254_v31 = vadd.f32 %v253_v29, %v721_v7  ;;  %v302_v32 = vadd.f32 %v301_v30, %v721_v7  ;;  %v255_v33 = vpop.f32.mrb[13].mxu0  ;;  %v303_v34 = vpop.f32.mrb[13].mxu1 }
 0x156   :  { %355 = vst [vmem:[#allocation7 + $0x58] sm:$0xff] %v323_v41  ;;  %371 = vst [vmem:[#allocation7 + $0xd8] sm:$0xff] %v339_v42  ;;  %v256_v56 = vadd.f32 %v255_v33, %v723_v8  ;;  %v304_v57 = vadd.f32 %v303_v34, %v723_v8 }
 0x157   :  { %v324_v54 = vadd.f32 %v254_v31, %v700_v60  ;;  %v340_v55 = vadd.f32 %v302_v32, %v702_v61 }
 0x158   :  { %v325_v35 = vadd.f32 %v256_v56, %v692_v58  ;;  %v341_v2 = vadd.f32 %v304_v57, %v694_v59  ;;  %v259_v38 = vpop.f32.mrb[14].mxu0  ;;  %v307_v39 = vpop.f32.mrb[14].mxu1 }
 0x159   :  { %356 = vst [vmem:[#allocation7 + $0x60] sm:$0xff] %v324_v54  ;;  %372 = vst [vmem:[#allocation7 + $0xe0] sm:$0xff] %v340_v55  ;;  %v260_v36 = vadd.f32 %v259_v38, %v721_v7  ;;  %v308_v37 = vadd.f32 %v307_v39, %v721_v7  ;;  %v261_v3 = vpop.f32.mrb[15].mxu0  ;;  %v309_v4 = vpop.f32.mrb[15].mxu1 }
 0x15a   :  { %357 = vst [vmem:[#allocation7 + $0x68] sm:$0xff] %v325_v35  ;;  %373 = vst [vmem:[#allocation7 + $0xe8] sm:$0xff] %v341_v2  ;;  %v262_v60 = vadd.f32 %v261_v3, %v723_v8  ;;  %v310_v58 = vadd.f32 %v309_v4, %v723_v8 }
 0x15b   :  { %v326_v59 = vadd.f32 %v260_v36, %v712_v0  ;;  %v342_v61 = vadd.f32 %v308_v37, %v714_v1 }
 0x15c   :  { %v327_v5 = vadd.f32 %v262_v60, %v704_v62  ;;  %v343_v6 = vadd.f32 %v310_v58, %v706_v63 }
 0x15d   :  { %358 = vst [vmem:[#allocation7 + $0x70] sm:$0xff] %v326_v59  ;;  %374 = vst [vmem:[#allocation7 + $0xf0] sm:$0xff] %v342_v61 }
 0x15e   :  { %359 = vst [vmem:[#allocation7 + $0x78] sm:$0xff] %v327_v5  ;;  %375 = vst [vmem:[#allocation7 + $0xf8] sm:$0xff] %v343_v6 }
 0x15f   :  { %550 = shalt.err (!%p547_p6)
}
 0x160   :  { %s551_s15 = scalar_lea.hbm %s807_s3, 4096 }
 0x161   :  { %p552_p7 = scmp.ne.s32.totalorder %s807_s3, %s551_s15  ;;  %p555_p8 = scmp.lt.u32.totalorder %s551_s15, %s807_s3 }
 0x163   :  { %p557_p9 = pnand %p555_p8, %p552_p7 }
 0x165   :  { %560 = shalt.err (!%p557_p9)
}
 0x166   :  { %387 = dma.vmem_to_hbm [thread:$0]  %s382_s11, 4096, %s807_s3, [#allocation4], %s568_s22, %s568_s22, %s569_s23  }
 0x167   :  { %565 = dma.done.wait [#allocation4], 4096  }
 0x168   :  { %566 = vsyncadd [#allocation4], 4294963200 }
 0x169   :  { %391 = vsyncpa [#allocation3], 1 }
 0x16a   :  { %392 = vsyncpa [#allocation6], 1 }
 0x16b   :  { %393 = vsyncpa [#allocation4], 1 }

// kernel: tpu_custom_call.1
= control target key start
LH: loop header
LB: loop body
LE: loop exit
PB: predicated region body
PF: predicated region fallthrough
CT: control target
= control target key end

     0   :  { %8 = vsyncpa [#allocation3], 0  ;;  %s804_s0 = inlined_call_operand.hbm [shape: f32[128,256], index: 0, kind: input, shape index: {}]   ;;  %s805_s1 = inlined_call_operand.hbm [shape: f32[256,256], index: 1, kind: input, shape index: {}]   ;;  %s806_s2 = inlined_call_operand.vmem [shape: f32[1,256], index: 2, kind: input, shape index: {}]   ;;  %s807_s3 = inlined_call_operand.hbm [shape: f32[128,256], index: 3, kind: output, shape index: {}]  }
   0x1   :  { %9 = vsyncpa [#allocation6], 0 }
   0x2   :  { %10 = vsyncpa [#allocation4], 0  ;;  %s567_s12 = smov [#allocation2]   ;;  %s495_s16 = scalar_lea.hbm %s804_s0, 4096 }
   0x3   :  { %s16_s13 = sshll.u32 %s567_s12, 4  ;;  %p496_p0 = scmp.ne.s32.totalorder %s804_s0, %s495_s16  ;;  %s17_s13 = int_to_ptr.vmem [resolvable:$true] %s16_s13 }
   0x4   :  { %p499_p1 = scmp.lt.u32.totalorder %s495_s16, %s804_s0 }
   0x6   :  { %p501_p2 = pnand %p499_p1, %p496_p0 }
   0x8   :  { %504 = shalt.err (!%p501_p2)
}
   0x9   :  { %s505_s21 = scalar_lea.vmem %s17_s13, 4096  ;;  %p510_p4 = scmp.lt.s32.totalorder %s17_s13, %s17_s13 }
   0xa   :  { %p506_p3 = scmp.ne.s32.totalorder %s17_s13, %s505_s21  ;;  %p511_p5 = scmp.lt.s32.totalorder %s505_s21, %s505_s21 }
   0xc   :  { %p512_p6 = por %p511_p5, %p510_p4 }
   0xe   :  { %p513_p7 = pnand %p512_p6, %p506_p3 }
  0x10   :  { %516 = shalt.err (!%p513_p7)
}
  0x11   :  { %s568_s22 = smov 256   ;;  %s569_s23 = smov 16  }
  0x12   :  { %22 = dma.hbm_to_vmem [thread:$0]  %s804_s0, 4096, %s17_s13, [#allocation3], %s568_s22, %s568_s22, %s569_s23  }
  0x13   :  { %s570_s26 = smov [#allocation5]   ;;  %s517_s30 = scalar_lea.hbm %s805_s1, 8192 }
  0x14   :  { %s28_s27 = sshll.u32 %s570_s26, 4  ;;  %p518_p8 = scmp.ne.s32.totalorder %s805_s1, %s517_s30  ;;  %s29_s27 = int_to_ptr.vmem [resolvable:$true] %s28_s27 }
  0x15   :  { %p521_p9 = scmp.lt.u32.totalorder %s517_s30, %s805_s1 }
  0x17   :  { %p523_p10 = pnand %p521_p9, %p518_p8 }
  0x19   :  { %526 = shalt.err (!%p523_p10)
}
  0x1a   :  { %s527_s8 = scalar_lea.vmem %s29_s27, 8192  ;;  %p532_p12 = scmp.lt.s32.totalorder %s29_s27, %s29_s27 }
  0x1b   :  { %p528_p11 = scmp.ne.s32.totalorder %s29_s27, %s527_s8  ;;  %p533_p13 = scmp.lt.s32.totalorder %s527_s8, %s527_s8 }
  0x1d   :  { %p534_p0 = por %p533_p13, %p532_p12 }
  0x1f   :  { %p535_p1 = pnand %p534_p0, %p528_p11 }
  0x21   :  { %538 = shalt.err (!%p535_p1)
}
  0x22   :  { %34 = dma.hbm_to_vmem [thread:$0]  %s805_s1, 8192, %s29_s27, [#allocation6], %s568_s22, %s568_s22, %s569_s23  }
  0x23   :  { %561 = dma.done.wait [#allocation3], 4096  }
  0x24   :  { %562 = vsyncadd [#allocation3], 4294963200 }
  0x25   :  { %563 = dma.done.wait [#allocation6], 8192  }
  0x26   :  { %564 = vsyncadd [#allocation6], 4294959104  ;;  %v76_v0 = vld [vmem:[#allocation5 + $0x8] sm:$0xff]  ;;  %v78_v1 = vld [vmem:[#allocation5 + $0x18] sm:$0xff] }
  0x27   :  { %v75_v2 = vld [vmem:[#allocation5] sm:$0xff]  ;;  %v394_v3 = vpack.c.bf16 %v78_v1, %v76_v0  ;;  %v77_v4 = vld [vmem:[#allocation5 + $0x10] sm:$0xff]  ;;  %v80_v5 = vld [vmem:[#allocation5 + $0x28] sm:$0xff] }
  0x28   :  { %v82_v6 = vld [vmem:[#allocation5 + $0x38] sm:$0xff]  ;;  %v396_v7 = vpack.c.bf16 %v77_v4, %v75_v2  ;;  %v79_v9 = vld [vmem:[#allocation5 + $0x20] sm:$0xff]  ;;  %v81_v10 = vld [vmem:[#allocation5 + $0x30] sm:$0xff] }
  0x29   :  { %v398_v8 = vpack.c.bf16 %v82_v6, %v80_v5  ;;  %v84_v11 = vld [vmem:[#allocation5 + $0x48] sm:$0xff]  ;;  %395 = vmatprep.subr.bf16.mxu0 %v394_v3  ;;  %458 = vmatprep.subr.bf16.mxu1 %v394_v3  ;;  %v86_v12 = vld [vmem:[#allocation5 + $0x58] sm:$0xff]  ;;  %v400_v13 = vpack.c.bf16 %v81_v10, %v79_v9  ;;  %v83_v15 = vld [vmem:[#allocation5 + $0x40] sm:$0xff] }
  0x2a   :  { %397 = vmatpush1.bf16.msra.mxu0 %v396_v7  ;;  %474 = vmatpush1.bf16.msra.mxu1 %v396_v7  ;;  %v402_v14 = vpack.c.bf16 %v86_v12, %v84_v11  ;;  %v85_v16 = vld [vmem:[#allocation5 + $0x50] sm:$0xff]  ;;  %v88_v17 = vld [vmem:[#allocation5 + $0x68] sm:$0xff]  ;;  %v90_v18 = vld [vmem:[#allocation5 + $0x78] sm:$0xff] }
  0x2b   :  { %399 = vmatprep.subr.bf16.mxu0 %v398_v8  ;;  %459 = vmatprep.subr.bf16.mxu1 %v398_v8  ;;  %v404_v19 = vpack.c.bf16 %v85_v16, %v83_v15  ;;  %v406_v20 = vpack.c.bf16 %v90_v18, %v88_v17  ;;  %v87_v21 = vld [vmem:[#allocation5 + $0x60] sm:$0xff]  ;;  %v89_v22 = vld [vmem:[#allocation5 + $0x70] sm:$0xff]  ;;  %v92_v23 = vld [vmem:[#allocation5 + $0x88] sm:$0xff] }
  0x2c   :  { %v94_v24 = vld [vmem:[#allocation5 + $0x98] sm:$0xff]  ;;  %v408_v25 = vpack.c.bf16 %v89_v22, %v87_v21  ;;  %v91_v27 = vld [vmem:[#allocation5 + $0x80] sm:$0xff]  ;;  %v93_v28 = vld [vmem:[#allocation5 + $0x90] sm:$0xff] }
  0x2d   :  { %v410_v26 = vpack.c.bf16 %v94_v24, %v92_v23  ;;  %v96_v29 = vld [vmem:[#allocation5 + $0xa8] sm:$0xff]  ;;  %v98_v30 = vld [vmem:[#allocation5 + $0xb8] sm:$0xff]  ;;  %v412_v31 = vpack.c.bf16 %v93_v28, %v91_v27  ;;  %v95_v33 = vld [vmem:[#allocation5 + $0xa0] sm:$0xff] }
  0x2e   :  { %401 = vmatpush1.bf16.msra.mxu0 %v400_v13  ;;  %475 = vmatpush1.bf16.msra.mxu1 %v400_v13  ;;  %v414_v32 = vpack.c.bf16 %v98_v30, %v96_v29  ;;  %v97_v34 = vld [vmem:[#allocation5 + $0xb0] sm:$0xff]  ;;  %v100_v35 = vld [vmem:[#allocation5 + $0xc8] sm:$0xff]  ;;  %v102_v36 = vld [vmem:[#allocation5 + $0xd8] sm:$0xff] }
  0x2f   :  { %403 = vmatprep.subr.bf16.mxu0 %v402_v14  ;;  %460 = vmatprep.subr.bf16.mxu1 %v402_v14  ;;  %v416_v37 = vpack.c.bf16 %v97_v34, %v95_v33  ;;  %v99_v38 = vld [vmem:[#allocation5 + $0xc0] sm:$0xff]  ;;  %v418_v39 = vpack.c.bf16 %v102_v36, %v100_v35  ;;  %v101_v40 = vld [vmem:[#allocation5 + $0xd0] sm:$0xff]  ;;  %v622_v41 = vld [vmem:[#allocation2 + $0x8] sm:$0xff] }
  0x30   :  { %v624_v42 = vld [vmem:[#allocation2 + $0x88] sm:$0xff]  ;;  %v106_v44 = vld [vmem:[#allocation5 + $0xf8] sm:$0xff]  ;;  %215 = vmatprep.mubr.f32.mxu0 %v622_v41  ;;  %v420_v45 = vpack.c.bf16 %v101_v40, %v99_v38  ;;  %v103_v47 = vld [vmem:[#allocation5 + $0xe0] sm:$0xff] }
  0x31   :  { %v104_v43 = vld [vmem:[#allocation5 + $0xe8] sm:$0xff]  ;;  %263 = vmatprep.mubr.f32.mxu1 %v624_v42  ;;  %v105_v48 = vld [vmem:[#allocation5 + $0xf0] sm:$0xff]  ;;  %v110_v50 = vld [vmem:[#allocation5 + $0x118] sm:$0xff] }
  0x32   :  { %405 = vmatpush1.bf16.msra.mxu0 %v404_v19  ;;  %476 = vmatpush1.bf16.msra.mxu1 %v404_v19  ;;  %v422_v46 = vpack.c.bf16 %v106_v44, %v104_v43  ;;  %v108_v49 = vld [vmem:[#allocation5 + $0x108] sm:$0xff]  ;;  %v424_v51 = vpack.c.bf16 %v105_v48, %v103_v47  ;;  %v107_v53 = vld [vmem:[#allocation5 + $0x100] sm:$0xff]  ;;  %v109_v54 = vld [vmem:[#allocation5 + $0x110] sm:$0xff] }
  0x33   :  { %407 = vmatprep.subr.bf16.mxu0 %v406_v20  ;;  %461 = vmatprep.subr.bf16.mxu1 %v406_v20  ;;  %v426_v52 = vpack.c.bf16 %v110_v50, %v108_v49  ;;  %v112_v55 = vld [vmem:[#allocation5 + $0x128] sm:$0xff]  ;;  %v114_v56 = vld [vmem:[#allocation5 + $0x138] sm:$0xff]  ;;  %v428_v57 = vpack.c.bf16 %v109_v54, %v107_v53  ;;  %v111_v59 = vld [vmem:[#allocation5 + $0x120] sm:$0xff] }
  0x34   :  { %v430_v58 = vpack.c.bf16 %v114_v56, %v112_v55  ;;  %v113_v60 = vld [vmem:[#allocation5 + $0x130] sm:$0xff]  ;;  %v116_v61 = vld [vmem:[#allocation5 + $0x148] sm:$0xff]  ;;  %v118_v62 = vld [vmem:[#allocation5 + $0x158] sm:$0xff] }
  0x35   :  { %v432_v63 = vpack.c.bf16 %v113_v60, %v111_v59  ;;  %v434_v0 = vpack.c.bf16 %v118_v62, %v116_v61  ;;  %v115_v1 = vld [vmem:[#allocation5 + $0x140] sm:$0xff]  ;;  %v117_v2 = vld [vmem:[#allocation5 + $0x150] sm:$0xff]  ;;  %v120_v3 = vld [vmem:[#allocation5 + $0x168] sm:$0xff] }
  0x36   :  { %409 = vmatpush1.bf16.msra.mxu0 %v408_v25  ;;  %477 = vmatpush1.bf16.msra.mxu1 %v408_v25  ;;  %v122_v4 = vld [vmem:[#allocation5 + $0x178] sm:$0xff]  ;;  %v436_v5 = vpack.c.bf16 %v117_v2, %v115_v1  ;;  %v119_v7 = vld [vmem:[#allocation5 + $0x160] sm:$0xff]  ;;  %v121_v8 = vld [vmem:[#allocation5 + $0x170] sm:$0xff]  ;;  %v141_v2 = vlaneseq }
  0x37   :  { %411 = vmatprep.subr.bf16.mxu0 %v410_v26  ;;  %462 = vmatprep.subr.bf16.mxu1 %v410_v26  ;;  %v438_v6 = vpack.c.bf16 %v122_v4, %v120_v3  ;;  %v124_v9 = vld [vmem:[#allocation5 + $0x188] sm:$0xff]  ;;  %v126_v10 = vld [vmem:[#allocation5 + $0x198] sm:$0xff]  ;;  %v440_v11 = vpack.c.bf16 %v121_v8, %v119_v7  ;;  %v123_v13 = vld [vmem:[#allocation5 + $0x180] sm:$0xff] }
  0x38   :  { %v442_v12 = vpack.c.bf16 %v126_v10, %v124_v9  ;;  %v125_v14 = vld [vmem:[#allocation5 + $0x190] sm:$0xff]  ;;  %v128_v15 = vld [vmem:[#allocation5 + $0x1a8] sm:$0xff]  ;;  %v130_v16 = vld [vmem:[#allocation5 + $0x1b8] sm:$0xff]  ;;  %v142_v3 = vshrl.u32 %v141_v2, 7 }
  0x39   :  { %v444_v17 = vpack.c.bf16 %v125_v14, %v123_v13  ;;  %v446_v18 = vpack.c.bf16 %v130_v16, %v128_v15  ;;  %v127_v19 = vld [vmem:[#allocation5 + $0x1a0] sm:$0xff]  ;;  %v129_v20 = vld [vmem:[#allocation5 + $0x1b0] sm:$0xff]  ;;  %v132_v21 = vld [vmem:[#allocation5 + $0x1c8] sm:$0xff] }
  0x3a   :  { %413 = vmatpush1.bf16.msra.mxu0 %v412_v31  ;;  %478 = vmatpush1.bf16.msra.mxu1 %v412_v31  ;;  %v134_v22 = vld [vmem:[#allocation5 + $0x1d8] sm:$0xff]  ;;  %v448_v23 = vpack.c.bf16 %v129_v20, %v127_v19  ;;  %v131_v25 = vld [vmem:[#allocation5 + $0x1c0] sm:$0xff]  ;;  %v133_v26 = vld [vmem:[#allocation5 + $0x1d0] sm:$0xff]  ;;  %v143_v4 = vsub.s32 0, %v142_v3 }
  0x3b   :  { %415 = vmatprep.subr.bf16.mxu0 %v414_v32  ;;  %463 = vmatprep.subr.bf16.mxu1 %v414_v32  ;;  %v450_v24 = vpack.c.bf16 %v134_v22, %v132_v21  ;;  %v136_v27 = vld [vmem:[#allocation5 + $0x1e8] sm:$0xff]  ;;  %v138_v28 = vld [vmem:[#allocation5 + $0x1f8] sm:$0xff]  ;;  %v452_v29 = vpack.c.bf16 %v133_v26, %v131_v25  ;;  %v135_v31 = vld [vmem:[#allocation5 + $0x1e0] sm:$0xff] }
  0x3c   :  { %v454_v30 = vpack.c.bf16 %v138_v28, %v136_v27  ;;  %v137_v32 = vld [vmem:[#allocation5 + $0x1f0] sm:$0xff]  ;;  %v628_v34 = vld [vmem:[#allocation2] sm:$0xff]  ;;  %v632_v36 = vld [vmem:[#allocation2 + $0x18] sm:$0xff] }
  0x3d   :  { %v456_v33 = vpack.c.bf16 %v137_v32, %v135_v31  ;;  %v630_v35 = vld [vmem:[#allocation2 + $0x80] sm:$0xff]  ;;  %v640_v38 = vld [vmem:[#allocation2 + $0x10] sm:$0xff]  ;;  %v644_v40 = vld [vmem:[#allocation2 + $0x28] sm:$0xff] }
  0x3e   :  { %417 = vmatpush1.bf16.msra.mxu0 %v416_v37  ;;  %479 = vmatpush1.bf16.msra.mxu1 %v416_v37  ;;  %v634_v37 = vld [vmem:[#allocation2 + $0x98] sm:$0xff]  ;;  %v646_v43 = vld [vmem:[#allocation2 + $0xa8] sm:$0xff]  ;;  %v652_v44 = vld [vmem:[#allocation2 + $0x20] sm:$0xff] }
  0x3f   :  { %419 = vmatprep.subr.bf16.mxu0 %v418_v39  ;;  %464 = vmatprep.subr.bf16.mxu1 %v418_v39  ;;  %v642_v39 = vld [vmem:[#allocation2 + $0x90] sm:$0xff]  ;;  %v658_v47 = vld [vmem:[#allocation2 + $0xb8] sm:$0xff]  ;;  %v668_v50 = vld [vmem:[#allocation2 + $0x48] sm:$0xff] }
  0x40   :  { %v664_v48 = vld [vmem:[#allocation2 + $0x30] sm:$0xff]  ;;  %v678_v53 = vld [vmem:[#allocation2 + $0xc0] sm:$0xff]  ;;  %v680_v54 = vld [vmem:[#allocation2 + $0x58] sm:$0xff] }
  0x41   :  { %v666_v49 = vld [vmem:[#allocation2 + $0xb0] sm:$0xff]  ;;  %v682_v55 = vld [vmem:[#allocation2 + $0xd8] sm:$0xff]  ;;  %v694_v59 = vld [vmem:[#allocation2 + $0xe8] sm:$0xff] }
  0x42   :  { %421 = vmatpush1.bf16.msra.mxu0 %v420_v45  ;;  %480 = vmatpush1.bf16.msra.mxu1 %v420_v45  ;;  %v654_v45 = vld [vmem:[#allocation2 + $0xa0] sm:$0xff]  ;;  %v688_v56 = vld [vmem:[#allocation2 + $0x50] sm:$0xff]  ;;  %v704_v62 = vld [vmem:[#allocation2 + $0x78] sm:$0xff] }
  0x43   :  { %423 = vmatprep.subr.bf16.mxu0 %v422_v46  ;;  %465 = vmatprep.subr.bf16.mxu1 %v422_v46  ;;  %v656_v46 = vld [vmem:[#allocation2 + $0x38] sm:$0xff]  ;;  %v700_v60 = vld [vmem:[#allocation2 + $0x60] sm:$0xff]  ;;  %v714_v1 = vld [vmem:[#allocation2 + $0xf0] sm:$0xff] }
  0x44   :  { %v702_v61 = vld [vmem:[#allocation2 + $0xe0] sm:$0xff] }
  0x46   :  { %425 = vmatpush1.bf16.msra.mxu0 %v424_v51  ;;  %481 = vmatpush1.bf16.msra.mxu1 %v424_v51  ;;  %v670_v51 = vld [vmem:[#allocation2 + $0xc8] sm:$0xff] }
  0x47   :  { %427 = vmatprep.subr.bf16.mxu0 %v426_v52  ;;  %466 = vmatprep.subr.bf16.mxu1 %v426_v52  ;;  %v676_v52 = vld [vmem:[#allocation2 + $0x40] sm:$0xff] }
  0x4a   :  { %429 = vmatpush1.bf16.msra.mxu0 %v428_v57  ;;  %482 = vmatpush1.bf16.msra.mxu1 %v428_v57  ;;  %v690_v57 = vld [vmem:[#allocation2 + $0xd0] sm:$0xff] }
  0x4b   :  { %431 = vmatprep.subr.bf16.mxu0 %v430_v58  ;;  %467 = vmatprep.subr.bf16.mxu1 %v430_v58  ;;  %v692_v58 = vld [vmem:[#allocation2 + $0x68] sm:$0xff] }
  0x4e   :  { %433 = vmatpush1.bf16.msra.mxu0 %v432_v63  ;;  %483 = vmatpush1.bf16.msra.mxu1 %v432_v63  ;;  %v706_v63 = vld [vmem:[#allocation2 + $0xf8] sm:$0xff] }
  0x4f   :  { %435 = vmatprep.subr.bf16.mxu0 %v434_v0  ;;  %468 = vmatprep.subr.bf16.mxu1 %v434_v0  ;;  %v712_v0 = vld [vmem:[#allocation2 + $0x70] sm:$0xff] }
  0x52   :  { %437 = vmatpush1.bf16.msra.mxu0 %v436_v5  ;;  %484 = vmatpush1.bf16.msra.mxu1 %v436_v5  ;;  %v139_v5 = vld [vmem:[%s806_s2] sm:$0x3]  ;;  %s571_s2 = smov [#allocation7]  }
  0x53   :  { %439 = vmatprep.subr.bf16.mxu0 %v438_v6  ;;  %469 = vmatprep.subr.bf16.mxu1 %v438_v6  ;;  %v147_v6 = vsub.s32 1, %v142_v3  ;;  %v721_v7 = vrot.slane %v139_v5, %v143_v4  ;;  %s381_s11 = sshll.u32 %s571_s2, 4  ;;  %s382_s11 = int_to_ptr.vmem [resolvable:$true] %s381_s11 }
  0x54   :  { %s539_s12 = scalar_lea.vmem %s382_s11, 4096  ;;  %p544_p3 = scmp.lt.s32.totalorder %s382_s11, %s382_s11 }
  0x55   :  { %v723_v8 = vrot.slane %v139_v5, %v147_v6  ;;  %p540_p2 = scmp.ne.s32.totalorder %s382_s11, %s539_s12  ;;  %p545_p4 = scmp.lt.s32.totalorder %s539_s12, %s539_s12 }
  0x56   :  { %441 = vmatpush1.bf16.msra.mxu0 %v440_v11  ;;  %485 = vmatpush1.bf16.msra.mxu1 %v440_v11 }
  0x57   :  { %443 = vmatprep.subr.bf16.mxu0 %v442_v12  ;;  %470 = vmatprep.subr.bf16.mxu1 %v442_v12  ;;  %p546_p5 = por %p545_p4, %p544_p3 }
  0x59   :  { %p547_p6 = pnand %p546_p5, %p540_p2 }
  0x5a   :  { %445 = vmatpush1.bf16.msra.mxu0 %v444_v17  ;;  %486 = vmatpush1.bf16.msra.mxu1 %v444_v17 }
  0x5b   :  { %447 = vmatprep.subr.bf16.mxu0 %v446_v18  ;;  %471 = vmatprep.subr.bf16.mxu1 %v446_v18 }
  0x5e   :  { %449 = vmatpush1.bf16.msra.mxu0 %v448_v23  ;;  %487 = vmatpush1.bf16.msra.mxu1 %v448_v23 }
  0x5f   :  { %451 = vmatprep.subr.bf16.mxu0 %v450_v24  ;;  %472 = vmatprep.subr.bf16.mxu1 %v450_v24 }
  0x62   :  { %453 = vmatpush1.bf16.msra.mxu0 %v452_v29  ;;  %488 = vmatpush1.bf16.msra.mxu1 %v452_v29 }
  0x63   :  { %455 = vmatprep.subr.bf16.mxu0 %v454_v30  ;;  %473 = vmatprep.subr.bf16.mxu1 %v454_v30 }
  0x66   :  { %457 = vmatpush1.bf16.msra.mxu0 %v456_v33  ;;  %489 = vmatpush1.bf16.msra.mxu1 %v456_v33 }
  0x69   :  { %216 = vmatmul.mubr.f32.vlgmr.msra.gmra.mrb[0].mxu0 %v628_v34  ;;  %264 = vmatmul.mubr.f32.vlgmr.msra.gmra.mrb[0].mxu1 %v630_v35 }
  0x6a   :  { %221 = vmatprep.mubr.f32.mxu0 %v632_v36  ;;  %269 = vmatprep.mubr.f32.mxu1 %v634_v37 }
  0x6d   :  { %222 = vmatmul.mubr.f32.gmra.mrb[2].mxu0 %v640_v38  ;;  %270 = vmatmul.mubr.f32.gmra.mrb[2].mxu1 %v642_v39 }
  0x6e   :  { %227 = vmatprep.mubr.f32.mxu0 %v644_v40  ;;  %275 = vmatprep.mubr.f32.mxu1 %v646_v43 }
  0x71   :  { %228 = vmatmul.mubr.f32.gmra.mrb[4].mxu0 %v652_v44  ;;  %276 = vmatmul.mubr.f32.gmra.mrb[4].mxu1 %v654_v45 }
  0x72   :  { %233 = vmatprep.mubr.f32.mxu0 %v656_v46  ;;  %281 = vmatprep.mubr.f32.mxu1 %v658_v47 }
  0x75   :  { %234 = vmatmul.mubr.f32.gmra.mrb[6].mxu0 %v664_v48  ;;  %282 = vmatmul.mubr.f32.gmra.mrb[6].mxu1 %v666_v49 }
  0x76   :  { %239 = vmatprep.mubr.f32.mxu0 %v668_v50  ;;  %287 = vmatprep.mubr.f32.mxu1 %v670_v51 }
  0x79   :  { %240 = vmatmul.mubr.f32.gmra.mrb[8].mxu0 %v676_v52  ;;  %288 = vmatmul.mubr.f32.gmra.mrb[8].mxu1 %v678_v53 }
  0x7a   :  { %245 = vmatprep.mubr.f32.mxu0 %v680_v54  ;;  %293 = vmatprep.mubr.f32.mxu1 %v682_v55 }
  0x7d   :  { %246 = vmatmul.mubr.f32.gmra.mrb[10].mxu0 %v688_v56  ;;  %294 = vmatmul.mubr.f32.gmra.mrb[10].mxu1 %v690_v57 }
  0x7e   :  { %251 = vmatprep.mubr.f32.mxu0 %v692_v58  ;;  %299 = vmatprep.mubr.f32.mxu1 %v694_v59 }
  0x81   :  { %252 = vmatmul.mubr.f32.gmra.mrb[12].mxu0 %v700_v60  ;;  %300 = vmatmul.mubr.f32.gmra.mrb[12].mxu1 %v702_v61 }
  0x82   :  { %257 = vmatprep.mubr.f32.mxu0 %v704_v62  ;;  %305 = vmatprep.mubr.f32.mxu1 %v706_v63 }
  0x85   :  { %258 = vmatmul.mubr.f32.gmra.mrb[14].mxu0 %v712_v0  ;;  %306 = vmatmul.mubr.f32.gmra.mrb[14].mxu1 %v714_v1 }
 0x13c   :  { %v217_v9 = vpop.f32.mrb[0].mxu0  ;;  %v265_v10 = vpop.f32.mrb[0].mxu1 }
 0x13d   :  { %v218_v11 = vadd.f32 %v217_v9, %v721_v7  ;;  %v266_v12 = vadd.f32 %v265_v10, %v721_v7  ;;  %v219_v13 = vpop.f32.mrb[1].mxu0  ;;  %v267_v14 = vpop.f32.mrb[1].mxu1 }
 0x13e   :  { %v220_v15 = vadd.f32 %v219_v13, %v723_v8  ;;  %v268_v16 = vadd.f32 %v267_v14, %v723_v8 }
 0x13f   :  { %v312_v17 = vadd.f32 %v218_v11, %v628_v34  ;;  %v328_v18 = vadd.f32 %v266_v12, %v630_v35 }
 0x140   :  { %v313_v19 = vadd.f32 %v220_v15, %v622_v41  ;;  %v329_v20 = vadd.f32 %v268_v16, %v624_v42  ;;  %v223_v21 = vpop.f32.mrb[2].mxu0  ;;  %v271_v22 = vpop.f32.mrb[2].mxu1 }
 0x141   :  { %344 = vst [vmem:[#allocation7] sm:$0xff] %v312_v17  ;;  %360 = vst [vmem:[#allocation7 + $0x80] sm:$0xff] %v328_v18  ;;  %v224_v23 = vadd.f32 %v223_v21, %v721_v7  ;;  %v272_v24 = vadd.f32 %v271_v22, %v721_v7  ;;  %v225_v25 = vpop.f32.mrb[3].mxu0  ;;  %v273_v26 = vpop.f32.mrb[3].mxu1 }
 0x142   :  { %345 = vst [vmem:[#allocation7 + $0x8] sm:$0xff] %v313_v19  ;;  %361 = vst [vmem:[#allocation7 + $0x88] sm:$0xff] %v329_v20  ;;  %v226_v27 = vadd.f32 %v225_v25, %v723_v8  ;;  %v274_v28 = vadd.f32 %v273_v26, %v723_v8 }
 0x143   :  { %v314_v41 = vadd.f32 %v224_v23, %v640_v38  ;;  %v330_v42 = vadd.f32 %v272_v24, %v642_v39 }
 0x144   :  { %v315_v29 = vadd.f32 %v226_v27, %v632_v36  ;;  %v331_v30 = vadd.f32 %v274_v28, %v634_v37  ;;  %v229_v31 = vpop.f32.mrb[4].mxu0  ;;  %v277_v32 = vpop.f32.mrb[4].mxu1 }
 0x145   :  { %346 = vst [vmem:[#allocation7 + $0x10] sm:$0xff] %v314_v41  ;;  %362 = vst [vmem:[#allocation7 + $0x90] sm:$0xff] %v330_v42  ;;  %v230_v33 = vadd.f32 %v229_v31, %v721_v7  ;;  %v278_v34 = vadd.f32 %v277_v32, %v721_v7  ;;  %v231_v35 = vpop.f32.mrb[5].mxu0  ;;  %v279_v2 = vpop.f32.mrb[5].mxu1 }
 0x146   :  { %347 = vst [vmem:[#allocation7 + $0x18] sm:$0xff] %v315_v29  ;;  %363 = vst [vmem:[#allocation7 + $0x98] sm:$0xff] %v331_v30  ;;  %v232_v38 = vadd.f32 %v231_v35, %v723_v8  ;;  %v280_v39 = vadd.f32 %v279_v2, %v723_v8 }
 0x147   :  { %v316_v36 = vadd.f32 %v230_v33, %v652_v44  ;;  %v332_v37 = vadd.f32 %v278_v34, %v654_v45 }
 0x148   :  { %v317_v3 = vadd.f32 %v232_v38, %v644_v40  ;;  %v333_v4 = vadd.f32 %v280_v39, %v646_v43  ;;  %v235_v5 = vpop.f32.mrb[6].mxu0  ;;  %v283_v6 = vpop.f32.mrb[6].mxu1 }
 0x149   :  { %348 = vst [vmem:[#allocation7 + $0x20] sm:$0xff] %v316_v36  ;;  %364 = vst [vmem:[#allocation7 + $0xa0] sm:$0xff] %v332_v37  ;;  %v236_v9 = vadd.f32 %v235_v5, %v721_v7  ;;  %v284_v10 = vadd.f32 %v283_v6, %v721_v7  ;;  %v237_v11 = vpop.f32.mrb[7].mxu0  ;;  %v285_v12 = vpop.f32.mrb[7].mxu1 }
 0x14a   :  { %349 = vst [vmem:[#allocation7 + $0x28] sm:$0xff] %v317_v3  ;;  %365 = vst [vmem:[#allocation7 + $0xa8] sm:$0xff] %v333_v4  ;;  %v238_v44 = vadd.f32 %v237_v11, %v723_v8  ;;  %v286_v45 = vadd.f32 %v285_v12, %v723_v8 }
 0x14b   :  { %v318_v40 = vadd.f32 %v236_v9, %v664_v48  ;;  %v334_v43 = vadd.f32 %v284_v10, %v666_v49 }
 0x14c   :  { %v319_v13 = vadd.f32 %v238_v44, %v656_v46  ;;  %v335_v14 = vadd.f32 %v286_v45, %v658_v47  ;;  %v241_v15 = vpop.f32.mrb[8].mxu0  ;;  %v289_v16 = vpop.f32.mrb[8].mxu1 }
 0x14d   :  { %350 = vst [vmem:[#allocation7 + $0x30] sm:$0xff] %v318_v40  ;;  %366 = vst [vmem:[#allocation7 + $0xb0] sm:$0xff] %v334_v43  ;;  %v242_v17 = vadd.f32 %v241_v15, %v721_v7  ;;  %v290_v18 = vadd.f32 %v289_v16, %v721_v7  ;;  %v243_v19 = vpop.f32.mrb[9].mxu0  ;;  %v291_v20 = vpop.f32.mrb[9].mxu1 }
 0x14e   :  { %351 = vst [vmem:[#allocation7 + $0x38] sm:$0xff] %v319_v13  ;;  %367 = vst [vmem:[#allocation7 + $0xb8] sm:$0xff] %v335_v14  ;;  %v244_v48 = vadd.f32 %v243_v19, %v723_v8  ;;  %v292_v49 = vadd.f32 %v291_v20, %v723_v8 }
 0x14f   :  { %v320_v46 = vadd.f32 %v242_v17, %v676_v52  ;;  %v336_v47 = vadd.f32 %v290_v18, %v678_v53 }
 0x150   :  { %v321_v21 = vadd.f32 %v244_v48, %v668_v50  ;;  %v337_v22 = vadd.f32 %v292_v49, %v670_v51  ;;  %v247_v23 = vpop.f32.mrb[10].mxu0  ;;  %v295_v24 = vpop.f32.mrb[10].mxu1 }
 0x151   :  { %352 = vst [vmem:[#allocation7 + $0x40] sm:$0xff] %v320_v46  ;;  %368 = vst [vmem:[#allocation7 + $0xc0] sm:$0xff] %v336_v47  ;;  %v248_v25 = vadd.f32 %v247_v23, %v721_v7  ;;  %v296_v26 = vadd.f32 %v295_v24, %v721_v7  ;;  %v249_v27 = vpop.f32.mrb[11].mxu0  ;;  %v297_v28 = vpop.f32.mrb[11].mxu1 }
 0x152   :  { %353 = vst [vmem:[#allocation7 + $0x48] sm:$0xff] %v321_v21  ;;  %369 = vst [vmem:[#allocation7 + $0xc8] sm:$0xff] %v337_v22  ;;  %v250_v52 = vadd.f32 %v249_v27, %v723_v8  ;;  %v298_v53 = vadd.f32 %v297_v28, %v723_v8 }
 0x153   :  { %v322_v50 = vadd.f32 %v248_v25, %v688_v56  ;;  %v338_v51 = vadd.f32 %v296_v26, %v690_v57 }
 0x154   :  { %v323_v41 = vadd.f32 %v250_v52, %v680_v54  ;;  %v339_v42 = vadd.f32 %v298_v53, %v682_v55  ;;  %v253_v29 = vpop.f32.mrb[12].mxu0  ;;  %v301_v30 = vpop.f32.mrb[12].mxu1 }
 0x155   :  { %354 = vst [vmem:[#allocation7 + $0x50] sm:$0xff] %v322_v50  ;;  %370 = vst [vmem:[#allocation7 + $0xd0] sm:$0xff] %v338_v51  ;;  %v254_v31 = vadd.f32 %v253_v29, %v721_v7  ;;  %v302_v32 = vadd.f32 %v301_v30, %v721_v7  ;;  %v255_v33 = vpop.f32.mrb[13].mxu0  ;;  %v303_v34 = vpop.f32.mrb[13].mxu1 }
 0x156   :  { %355 = vst [vmem:[#allocation7 + $0x58] sm:$0xff] %v323_v41  ;;  %371 = vst [vmem:[#allocation7 + $0xd8] sm:$0xff] %v339_v42  ;;  %v256_v56 = vadd.f32 %v255_v33, %v723_v8  ;;  %v304_v57 = vadd.f32 %v303_v34, %v723_v8 }
 0x157   :  { %v324_v54 = vadd.f32 %v254_v31, %v700_v60  ;;  %v340_v55 = vadd.f32 %v302_v32, %v702_v61 }
 0x158   :  { %v325_v35 = vadd.f32 %v256_v56, %v692_v58  ;;  %v341_v2 = vadd.f32 %v304_v57, %v694_v59  ;;  %v259_v38 = vpop.f32.mrb[14].mxu0  ;;  %v307_v39 = vpop.f32.mrb[14].mxu1 }
 0x159   :  { %356 = vst [vmem:[#allocation7 + $0x60] sm:$0xff] %v324_v54  ;;  %372 = vst [vmem:[#allocation7 + $0xe0] sm:$0xff] %v340_v55  ;;  %v260_v36 = vadd.f32 %v259_v38, %v721_v7  ;;  %v308_v37 = vadd.f32 %v307_v39, %v721_v7  ;;  %v261_v3 = vpop.f32.mrb[15].mxu0  ;;  %v309_v4 = vpop.f32.mrb[15].mxu1 }
 0x15a   :  { %357 = vst [vmem:[#allocation7 + $0x68] sm:$0xff] %v325_v35  ;;  %373 = vst [vmem:[#allocation7 + $0xe8] sm:$0xff] %v341_v2  ;;  %v262_v60 = vadd.f32 %v261_v3, %v723_v8  ;;  %v310_v58 = vadd.f32 %v309_v4, %v723_v8 }
 0x15b   :  { %v326_v59 = vadd.f32 %v260_v36, %v712_v0  ;;  %v342_v61 = vadd.f32 %v308_v37, %v714_v1 }
 0x15c   :  { %v327_v5 = vadd.f32 %v262_v60, %v704_v62  ;;  %v343_v6 = vadd.f32 %v310_v58, %v706_v63 }
 0x15d   :  { %358 = vst [vmem:[#allocation7 + $0x70] sm:$0xff] %v326_v59  ;;  %374 = vst [vmem:[#allocation7 + $0xf0] sm:$0xff] %v342_v61 }
 0x15e   :  { %359 = vst [vmem:[#allocation7 + $0x78] sm:$0xff] %v327_v5  ;;  %375 = vst [vmem:[#allocation7 + $0xf8] sm:$0xff] %v343_v6 }
 0x15f   :  { %550 = shalt.err (!%p547_p6)
}
 0x160   :  { %s551_s15 = scalar_lea.hbm %s807_s3, 4096 }
 0x161   :  { %p552_p7 = scmp.ne.s32.totalorder %s807_s3, %s551_s15  ;;  %p555_p8 = scmp.lt.u32.totalorder %s551_s15, %s807_s3 }
 0x163   :  { %p557_p9 = pnand %p555_p8, %p552_p7 }
 0x165   :  { %560 = shalt.err (!%p557_p9)
}
 0x166   :  { %387 = dma.vmem_to_hbm [thread:$0]  %s382_s11, 4096, %s807_s3, [#allocation4], %s568_s22, %s568_s22, %s569_s23  }
 0x167   :  { %565 = dma.done.wait [#allocation4], 4096  }
 0x168   :  { %566 = vsyncadd [#allocation4], 4294963200 }
 0x169   :  { %391 = vsyncpa [#allocation3], 1 }
 0x16a   :  { %392 = vsyncpa [#allocation6], 1 }
 0x16b   :  { %393 = vsyncpa [#allocation4], 1 }

</bundles_post_ra>
